<compile_context>
chip_gen: v7x
topology: tpu7x:2x2x1
jax: 0.10.0
libtpu: 0.0.40
codegen_flags: <defaults>
</compile_context>

<pallas_src>
import jax
import jax.numpy as jnp
from jax.experimental import pallas as pl
from jax.experimental.pallas import tpu as pltpu

HIDDEN_SIZE = 300
NUM_LABELS = 2
LANE = 128     # lane-dense padding for the tiny num_labels dimension
B_TILE = 8     # examples per grid step -> full (8, 128) output blocks


def bert_seq_classify(input_ids, embed_table, cls_weight, cls_bias,
                      table_dtype=jnp.float32):
    """input_ids:   [B, S] int32
       embed_table: [V, H] f32
       cls_weight:  [L, H] f32   (torch nn.Linear layout)
       cls_bias:    [L]    f32
       returns logits [B, L] f32
    """
    B, S = input_ids.shape
    V, H = embed_table.shape
    L = cls_weight.shape[0]

    B_pad = ((B + B_TILE - 1) // B_TILE) * B_TILE
    V_pad = ((V + 7) // 8) * 8

    # ---- One-time algebraic restructuring ----------------------------------
    # proj[v, :] = embed_table[v, :] @ cls_weight.T, padded to 128 lanes so the
    # gathered rows and the output are lane-dense.  HIGHEST keeps true f32.
    w_pad = jnp.zeros((LANE, H), embed_table.dtype).at[:L, :].set(cls_weight)
    proj = jnp.einsum("vh,lh->vl", embed_table, w_pad,
                      precision=jax.lax.Precision.HIGHEST)           # [V, LANE]
    proj = jnp.zeros((V_pad, LANE), jnp.float32).at[:V, :].set(proj)
    proj = proj.astype(table_dtype)                                   # bf16 optional

    # Flat 1-D ids in SMEM (tight padding); clamp for safety, pad batch with 0.
    ids = jnp.clip(input_ids.astype(jnp.int32), 0, V - 1)
    ids_flat = jnp.zeros((B_pad * S,), jnp.int32).at[: B * S].set(ids.reshape(-1))

    table_bytes = V_pad * LANE * jnp.dtype(table_dtype).itemsize
    out_bytes = B_pad * LANE * 4
    cost = pl.CostEstimate(
        flops=B_pad * S * LANE,
        transcendentals=0,
        bytes_accessed=table_bytes + out_bytes + B_pad * S * 4)

    # Scoped-VMEM budget: table (possibly double-buffered by the pipeline) plus
    # headroom.  For GloVe-scale vocabs on v7x (64 MiB VMEM), use bf16 table or
    # fall back to chunked gathers.
    vmem_limit = int(min(128 * 1024 * 1024,
                         max(16 * 1024 * 1024,
                             2 * table_bytes + 4 * out_bytes + (4 << 20))))

    def kernel(ids_ref, proj_ref, out_ref):
        # ids_ref : [B_pad*S] int32 in SMEM (scalar prefetch)
        # proj_ref: [V_pad, LANE]  VMEM-resident projected table (index (0,0)
        #           for every grid step -> DMA'd from HBM only once)
        # out_ref : [B_TILE, LANE] per-tile output block
        tile = pl.program_id(0)
        base = tile * (B_TILE * S)
        rows = []
        for b in range(B_TILE):  # static; fully unrolled over the 8 examples
            def tok(s, acc, b=b):
                tid = ids_ref[base + b * S + s]
                row = proj_ref[pl.ds(tid, 1), :].astype(jnp.float32)
                return acc + row
            acc = jax.lax.fori_loop(0, S, tok,
                                    jnp.zeros((1, LANE), jnp.float32),
                                    unroll=True)
            rows.append(acc)
        out_ref[...] = jnp.concatenate(rows, axis=0)   # one dense (8,128) store

    pooled_proj = pl.pallas_call(
        kernel,
        out_shape=jax.ShapeDtypeStruct((B_pad, LANE), jnp.float32),
        grid_spec=pltpu.PrefetchScalarGridSpec(
            num_scalar_prefetch=1,                 # ids -> SMEM
            grid=(B_pad // B_TILE,),               # one step per 8-example tile
            in_specs=[
                # Full-array block, constant index -> table resident in VMEM.
                pl.BlockSpec((V_pad, LANE), lambda i, ids: (0, 0)),
            ],
            out_specs=pl.BlockSpec((B_TILE, LANE), lambda i, ids: (i, 0)),
        ),
        compiler_params=pltpu.CompilerParams(
            dimension_semantics=("parallel",),     # megacore-shardable on v7x
            vmem_limit_bytes=vmem_limit),
        cost_estimate=cost,
    )(ids_flat, proj)

    # Bias folded in after the kernel; slice real batch rows and real L lanes.
    logits = pooled_proj[:B, :L] + cls_bias[None, :]
    return logits


if __name__ == "__main__":
    key = jax.random.PRNGKey(0)
    k_embed, k_w, k_ids = jax.random.split(key, 3)

    B, S = 2, 8
    VOCAB = 50

    # Deterministic synthetic "pretrained" embedding table (word2vec stand-in).
    embed_table = jax.random.normal(k_embed, (VOCAB, HIDDEN_SIZE), dtype=jnp.float32)

    # Classifier: xavier_normal_ init for weight [num_labels, hidden], zero bias.
    xavier_std = (2.0 / (HIDDEN_SIZE + NUM_LABELS)) ** 0.5
    cls_weight = xavier_std * jax.random.normal(
        k_w, (NUM_LABELS, HIDDEN_SIZE), dtype=jnp.float32)
    cls_bias = jnp.zeros((NUM_LABELS,), dtype=jnp.float32)

    input_ids = jax.random.randint(k_ids, (B, S), 0, VOCAB, dtype=jnp.int32)

    logits = bert_seq_classify(input_ids, embed_table, cls_weight, cls_bias)
    logits = jax.block_until_ready(logits)

    # Pure-JAX reference (module semantics: gather -> sum over seq -> linear).
    pooled_ref = jnp.take(embed_table, input_ids, axis=0).sum(axis=1)
    ref = jnp.einsum("bh,lh->bl", pooled_ref, cls_weight,
                     precision=jax.lax.Precision.HIGHEST) + cls_bias

    assert logits.shape == (B, NUM_LABELS)
    # NOTE: project-then-sum reorders the FP reduction vs the reference
    # sum-then-project; 1e-3 tolerances are comfortable at these magnitudes.
    assert jnp.allclose(logits, ref, atol=1e-3, rtol=1e-3)

    print("KERNEL_OK")
</pallas_src>

<mosaic_0001>
module attributes {stable_mosaic.version = 11 : i64} {
  func.func @kernel(%arg0: i32, %arg1: memref<64xi32, #tpu.memory_space<smem>>, %arg2: memref<56x128xf32, #tpu.memory_space<vmem>>, %arg3: memref<8x128xf32, #tpu.memory_space<vmem>>) attributes {dimension_semantics = [#tpu.dimension_semantics<parallel>], iteration_bounds = array<i64: 1>, scalar_prefetch = 1 : i64, scratch_operands = 0 : i64, tpu.core_type = #tpu.core_type<tc>, window_params = [{pipeline_mode = #tpu.pipeline_mode<synchronous>, transform_indices = @transform_0, window_bounds = array<i64: 56, 128>}, {transform_indices = @transform_1, window_bounds = array<i64: 8, 128>}]} {
    %c64_i32 = arith.constant 64 : i32
    %0 = arith.muli %arg0, %c64_i32 : i32
    %cst = arith.constant 0.000000e+00 : f32
    %1 = vector.broadcast %cst : f32 to vector<1x128xf32>
    %c0_i32 = arith.constant 0 : i32
    %c0_i32_0 = arith.constant 0 : i32
    %2 = arith.addi %0, %c0_i32_0 : i32
    %3 = arith.addi %2, %c0_i32 : i32
    %4 = arith.index_cast %3 : i32 to index
    %5 = memref.load %arg1[%4] : memref<64xi32, #tpu.memory_space<smem>>
    %6 = arith.index_cast %5 : i32 to index
    %c0 = arith.constant 0 : index
    %7 = vector.load %arg2[%6, %c0] : memref<56x128xf32, #tpu.memory_space<vmem>>, vector<1x128xf32>
    %8 = arith.addf %1, %7 : vector<1x128xf32>
    %c1_i32 = arith.constant 1 : i32
    %c0_i32_1 = arith.constant 0 : i32
    %9 = arith.addi %0, %c0_i32_1 : i32
    %10 = arith.addi %9, %c1_i32 : i32
    %11 = arith.index_cast %10 : i32 to index
    %12 = memref.load %arg1[%11] : memref<64xi32, #tpu.memory_space<smem>>
    %13 = arith.index_cast %12 : i32 to index
    %c0_2 = arith.constant 0 : index
    %14 = vector.load %arg2[%13, %c0_2] : memref<56x128xf32, #tpu.memory_space<vmem>>, vector<1x128xf32>
    %15 = arith.addf %8, %14 : vector<1x128xf32>
    %c2_i32 = arith.constant 2 : i32
    %c0_i32_3 = arith.constant 0 : i32
    %16 = arith.addi %0, %c0_i32_3 : i32
    %17 = arith.addi %16, %c2_i32 : i32
    %18 = arith.index_cast %17 : i32 to index
    %19 = memref.load %arg1[%18] : memref<64xi32, #tpu.memory_space<smem>>
    %20 = arith.index_cast %19 : i32 to index
    %c0_4 = arith.constant 0 : index
    %21 = vector.load %arg2[%20, %c0_4] : memref<56x128xf32, #tpu.memory_space<vmem>>, vector<1x128xf32>
    %22 = arith.addf %15, %21 : vector<1x128xf32>
    %c3_i32 = arith.constant 3 : i32
    %c0_i32_5 = arith.constant 0 : i32
    %23 = arith.addi %0, %c0_i32_5 : i32
    %24 = arith.addi %23, %c3_i32 : i32
    %25 = arith.index_cast %24 : i32 to index
    %26 = memref.load %arg1[%25] : memref<64xi32, #tpu.memory_space<smem>>
    %27 = arith.index_cast %26 : i32 to index
    %c0_6 = arith.constant 0 : index
    %28 = vector.load %arg2[%27, %c0_6] : memref<56x128xf32, #tpu.memory_space<vmem>>, vector<1x128xf32>
    %29 = arith.addf %22, %28 : vector<1x128xf32>
    %c4_i32 = arith.constant 4 : i32
    %c0_i32_7 = arith.constant 0 : i32
    %30 = arith.addi %0, %c0_i32_7 : i32
    %31 = arith.addi %30, %c4_i32 : i32
    %32 = arith.index_cast %31 : i32 to index
    %33 = memref.load %arg1[%32] : memref<64xi32, #tpu.memory_space<smem>>
    %34 = arith.index_cast %33 : i32 to index
    %c0_8 = arith.constant 0 : index
    %35 = vector.load %arg2[%34, %c0_8] : memref<56x128xf32, #tpu.memory_space<vmem>>, vector<1x128xf32>
    %36 = arith.addf %29, %35 : vector<1x128xf32>
    %c5_i32 = arith.constant 5 : i32
    %c0_i32_9 = arith.constant 0 : i32
    %37 = arith.addi %0, %c0_i32_9 : i32
    %38 = arith.addi %37, %c5_i32 : i32
    %39 = arith.index_cast %38 : i32 to index
    %40 = memref.load %arg1[%39] : memref<64xi32, #tpu.memory_space<smem>>
    %41 = arith.index_cast %40 : i32 to index
    %c0_10 = arith.constant 0 : index
    %42 = vector.load %arg2[%41, %c0_10] : memref<56x128xf32, #tpu.memory_space<vmem>>, vector<1x128xf32>
    %43 = arith.addf %36, %42 : vector<1x128xf32>
    %c6_i32 = arith.constant 6 : i32
    %c0_i32_11 = arith.constant 0 : i32
    %44 = arith.addi %0, %c0_i32_11 : i32
    %45 = arith.addi %44, %c6_i32 : i32
    %46 = arith.index_cast %45 : i32 to index
    %47 = memref.load %arg1[%46] : memref<64xi32, #tpu.memory_space<smem>>
    %48 = arith.index_cast %47 : i32 to index
    %c0_12 = arith.constant 0 : index
    %49 = vector.load %arg2[%48, %c0_12] : memref<56x128xf32, #tpu.memory_space<vmem>>, vector<1x128xf32>
    %50 = arith.addf %43, %49 : vector<1x128xf32>
    %c7_i32 = arith.constant 7 : i32
    %c0_i32_13 = arith.constant 0 : i32
    %51 = arith.addi %0, %c0_i32_13 : i32
    %52 = arith.addi %51, %c7_i32 : i32
    %53 = arith.index_cast %52 : i32 to index
    %54 = memref.load %arg1[%53] : memref<64xi32, #tpu.memory_space<smem>>
    %55 = arith.index_cast %54 : i32 to index
    %c0_14 = arith.constant 0 : index
    %56 = vector.load %arg2[%55, %c0_14] : memref<56x128xf32, #tpu.memory_space<vmem>>, vector<1x128xf32>
    %57 = arith.addf %50, %56 : vector<1x128xf32>
    %c8_i32 = arith.constant 8 : i32
    %cst_15 = arith.constant 0.000000e+00 : f32
    %58 = vector.broadcast %cst_15 : f32 to vector<1x128xf32>
    %c0_i32_16 = arith.constant 0 : i32
    %c8_i32_17 = arith.constant 8 : i32
    %59 = arith.addi %0, %c8_i32_17 : i32
    %60 = arith.addi %59, %c0_i32_16 : i32
    %61 = arith.index_cast %60 : i32 to index
    %62 = memref.load %arg1[%61] : memref<64xi32, #tpu.memory_space<smem>>
    %63 = arith.index_cast %62 : i32 to index
    %c0_18 = arith.constant 0 : index
    %64 = vector.load %arg2[%63, %c0_18] : memref<56x128xf32, #tpu.memory_space<vmem>>, vector<1x128xf32>
    %65 = arith.addf %58, %64 : vector<1x128xf32>
    %c1_i32_19 = arith.constant 1 : i32
    %c8_i32_20 = arith.constant 8 : i32
    %66 = arith.addi %0, %c8_i32_20 : i32
    %67 = arith.addi %66, %c1_i32_19 : i32
    %68 = arith.index_cast %67 : i32 to index
    %69 = memref.load %arg1[%68] : memref<64xi32, #tpu.memory_space<smem>>
    %70 = arith.index_cast %69 : i32 to index
    %c0_21 = arith.constant 0 : index
    %71 = vector.load %arg2[%70, %c0_21] : memref<56x128xf32, #tpu.memory_space<vmem>>, vector<1x128xf32>
    %72 = arith.addf %65, %71 : vector<1x128xf32>
    %c2_i32_22 = arith.constant 2 : i32
    %c8_i32_23 = arith.constant 8 : i32
    %73 = arith.addi %0, %c8_i32_23 : i32
    %74 = arith.addi %73, %c2_i32_22 : i32
    %75 = arith.index_cast %74 : i32 to index
    %76 = memref.load %arg1[%75] : memref<64xi32, #tpu.memory_space<smem>>
    %77 = arith.index_cast %76 : i32 to index
    %c0_24 = arith.constant 0 : index
    %78 = vector.load %arg2[%77, %c0_24] : memref<56x128xf32, #tpu.memory_space<vmem>>, vector<1x128xf32>
    %79 = arith.addf %72, %78 : vector<1x128xf32>
    %c3_i32_25 = arith.constant 3 : i32
    %c8_i32_26 = arith.constant 8 : i32
    %80 = arith.addi %0, %c8_i32_26 : i32
    %81 = arith.addi %80, %c3_i32_25 : i32
    %82 = arith.index_cast %81 : i32 to index
    %83 = memref.load %arg1[%82] : memref<64xi32, #tpu.memory_space<smem>>
    %84 = arith.index_cast %83 : i32 to index
    %c0_27 = arith.constant 0 : index
    %85 = vector.load %arg2[%84, %c0_27] : memref<56x128xf32, #tpu.memory_space<vmem>>, vector<1x128xf32>
    %86 = arith.addf %79, %85 : vector<1x128xf32>
    %c4_i32_28 = arith.constant 4 : i32
    %c8_i32_29 = arith.constant 8 : i32
    %87 = arith.addi %0, %c8_i32_29 : i32
    %88 = arith.addi %87, %c4_i32_28 : i32
    %89 = arith.index_cast %88 : i32 to index
    %90 = memref.load %arg1[%89] : memref<64xi32, #tpu.memory_space<smem>>
    %91 = arith.index_cast %90 : i32 to index
    %c0_30 = arith.constant 0 : index
    %92 = vector.load %arg2[%91, %c0_30] : memref<56x128xf32, #tpu.memory_space<vmem>>, vector<1x128xf32>
    %93 = arith.addf %86, %92 : vector<1x128xf32>
    %c5_i32_31 = arith.constant 5 : i32
    %c8_i32_32 = arith.constant 8 : i32
    %94 = arith.addi %0, %c8_i32_32 : i32
    %95 = arith.addi %94, %c5_i32_31 : i32
    %96 = arith.index_cast %95 : i32 to index
    %97 = memref.load %arg1[%96] : memref<64xi32, #tpu.memory_space<smem>>
    %98 = arith.index_cast %97 : i32 to index
    %c0_33 = arith.constant 0 : index
    %99 = vector.load %arg2[%98, %c0_33] : memref<56x128xf32, #tpu.memory_space<vmem>>, vector<1x128xf32>
    %100 = arith.addf %93, %99 : vector<1x128xf32>
    %c6_i32_34 = arith.constant 6 : i32
    %c8_i32_35 = arith.constant 8 : i32
    %101 = arith.addi %0, %c8_i32_35 : i32
    %102 = arith.addi %101, %c6_i32_34 : i32
    %103 = arith.index_cast %102 : i32 to index
    %104 = memref.load %arg1[%103] : memref<64xi32, #tpu.memory_space<smem>>
    %105 = arith.index_cast %104 : i32 to index
    %c0_36 = arith.constant 0 : index
    %106 = vector.load %arg2[%105, %c0_36] : memref<56x128xf32, #tpu.memory_space<vmem>>, vector<1x128xf32>
    %107 = arith.addf %100, %106 : vector<1x128xf32>
    %c7_i32_37 = arith.constant 7 : i32
    %c8_i32_38 = arith.constant 8 : i32
    %108 = arith.addi %0, %c8_i32_38 : i32
    %109 = arith.addi %108, %c7_i32_37 : i32
    %110 = arith.index_cast %109 : i32 to index
    %111 = memref.load %arg1[%110] : memref<64xi32, #tpu.memory_space<smem>>
    %112 = arith.index_cast %111 : i32 to index
    %c0_39 = arith.constant 0 : index
    %113 = vector.load %arg2[%112, %c0_39] : memref<56x128xf32, #tpu.memory_space<vmem>>, vector<1x128xf32>
    %114 = arith.addf %107, %113 : vector<1x128xf32>
    %c8_i32_40 = arith.constant 8 : i32
    %cst_41 = arith.constant 0.000000e+00 : f32
    %115 = vector.broadcast %cst_41 : f32 to vector<1x128xf32>
    %c0_i32_42 = arith.constant 0 : i32
    %c16_i32 = arith.constant 16 : i32
    %116 = arith.addi %0, %c16_i32 : i32
    %117 = arith.addi %116, %c0_i32_42 : i32
    %118 = arith.index_cast %117 : i32 to index
    %119 = memref.load %arg1[%118] : memref<64xi32, #tpu.memory_space<smem>>
    %120 = arith.index_cast %119 : i32 to index
    %c0_43 = arith.constant 0 : index
    %121 = vector.load %arg2[%120, %c0_43] : memref<56x128xf32, #tpu.memory_space<vmem>>, vector<1x128xf32>
    %122 = arith.addf %115, %121 : vector<1x128xf32>
    %c1_i32_44 = arith.constant 1 : i32
    %c16_i32_45 = arith.constant 16 : i32
    %123 = arith.addi %0, %c16_i32_45 : i32
    %124 = arith.addi %123, %c1_i32_44 : i32
    %125 = arith.index_cast %124 : i32 to index
    %126 = memref.load %arg1[%125] : memref<64xi32, #tpu.memory_space<smem>>
    %127 = arith.index_cast %126 : i32 to index
    %c0_46 = arith.constant 0 : index
    %128 = vector.load %arg2[%127, %c0_46] : memref<56x128xf32, #tpu.memory_space<vmem>>, vector<1x128xf32>
    %129 = arith.addf %122, %128 : vector<1x128xf32>
    %c2_i32_47 = arith.constant 2 : i32
    %c16_i32_48 = arith.constant 16 : i32
    %130 = arith.addi %0, %c16_i32_48 : i32
    %131 = arith.addi %130, %c2_i32_47 : i32
    %132 = arith.index_cast %131 : i32 to index
    %133 = memref.load %arg1[%132] : memref<64xi32, #tpu.memory_space<smem>>
    %134 = arith.index_cast %133 : i32 to index
    %c0_49 = arith.constant 0 : index
    %135 = vector.load %arg2[%134, %c0_49] : memref<56x128xf32, #tpu.memory_space<vmem>>, vector<1x128xf32>
    %136 = arith.addf %129, %135 : vector<1x128xf32>
    %c3_i32_50 = arith.constant 3 : i32
    %c16_i32_51 = arith.constant 16 : i32
    %137 = arith.addi %0, %c16_i32_51 : i32
    %138 = arith.addi %137, %c3_i32_50 : i32
    %139 = arith.index_cast %138 : i32 to index
    %140 = memref.load %arg1[%139] : memref<64xi32, #tpu.memory_space<smem>>
    %141 = arith.index_cast %140 : i32 to index
    %c0_52 = arith.constant 0 : index
    %142 = vector.load %arg2[%141, %c0_52] : memref<56x128xf32, #tpu.memory_space<vmem>>, vector<1x128xf32>
    %143 = arith.addf %136, %142 : vector<1x128xf32>
    %c4_i32_53 = arith.constant 4 : i32
    %c16_i32_54 = arith.constant 16 : i32
    %144 = arith.addi %0, %c16_i32_54 : i32
    %145 = arith.addi %144, %c4_i32_53 : i32
    %146 = arith.index_cast %145 : i32 to index
    %147 = memref.load %arg1[%146] : memref<64xi32, #tpu.memory_space<smem>>
    %148 = arith.index_cast %147 : i32 to index
    %c0_55 = arith.constant 0 : index
    %149 = vector.load %arg2[%148, %c0_55] : memref<56x128xf32, #tpu.memory_space<vmem>>, vector<1x128xf32>
    %150 = arith.addf %143, %149 : vector<1x128xf32>
    %c5_i32_56 = arith.constant 5 : i32
    %c16_i32_57 = arith.constant 16 : i32
    %151 = arith.addi %0, %c16_i32_57 : i32
    %152 = arith.addi %151, %c5_i32_56 : i32
    %153 = arith.index_cast %152 : i32 to index
    %154 = memref.load %arg1[%153] : memref<64xi32, #tpu.memory_space<smem>>
    %155 = arith.index_cast %154 : i32 to index
    %c0_58 = arith.constant 0 : index
    %156 = vector.load %arg2[%155, %c0_58] : memref<56x128xf32, #tpu.memory_space<vmem>>, vector<1x128xf32>
    %157 = arith.addf %150, %156 : vector<1x128xf32>
    %c6_i32_59 = arith.constant 6 : i32
    %c16_i32_60 = arith.constant 16 : i32
    %158 = arith.addi %0, %c16_i32_60 : i32
    %159 = arith.addi %158, %c6_i32_59 : i32
    %160 = arith.index_cast %159 : i32 to index
    %161 = memref.load %arg1[%160] : memref<64xi32, #tpu.memory_space<smem>>
    %162 = arith.index_cast %161 : i32 to index
    %c0_61 = arith.constant 0 : index
    %163 = vector.load %arg2[%162, %c0_61] : memref<56x128xf32, #tpu.memory_space<vmem>>, vector<1x128xf32>
    %164 = arith.addf %157, %163 : vector<1x128xf32>
    %c7_i32_62 = arith.constant 7 : i32
    %c16_i32_63 = arith.constant 16 : i32
    %165 = arith.addi %0, %c16_i32_63 : i32
    %166 = arith.addi %165, %c7_i32_62 : i32
    %167 = arith.index_cast %166 : i32 to index
    %168 = memref.load %arg1[%167] : memref<64xi32, #tpu.memory_space<smem>>
    %169 = arith.index_cast %168 : i32 to index
    %c0_64 = arith.constant 0 : index
    %170 = vector.load %arg2[%169, %c0_64] : memref<56x128xf32, #tpu.memory_space<vmem>>, vector<1x128xf32>
    %171 = arith.addf %164, %170 : vector<1x128xf32>
    %c8_i32_65 = arith.constant 8 : i32
    %cst_66 = arith.constant 0.000000e+00 : f32
    %172 = vector.broadcast %cst_66 : f32 to vector<1x128xf32>
    %c0_i32_67 = arith.constant 0 : i32
    %c24_i32 = arith.constant 24 : i32
    %173 = arith.addi %0, %c24_i32 : i32
    %174 = arith.addi %173, %c0_i32_67 : i32
    %175 = arith.index_cast %174 : i32 to index
    %176 = memref.load %arg1[%175] : memref<64xi32, #tpu.memory_space<smem>>
    %177 = arith.index_cast %176 : i32 to index
    %c0_68 = arith.constant 0 : index
    %178 = vector.load %arg2[%177, %c0_68] : memref<56x128xf32, #tpu.memory_space<vmem>>, vector<1x128xf32>
    %179 = arith.addf %172, %178 : vector<1x128xf32>
    %c1_i32_69 = arith.constant 1 : i32
    %c24_i32_70 = arith.constant 24 : i32
    %180 = arith.addi %0, %c24_i32_70 : i32
    %181 = arith.addi %180, %c1_i32_69 : i32
    %182 = arith.index_cast %181 : i32 to index
    %183 = memref.load %arg1[%182] : memref<64xi32, #tpu.memory_space<smem>>
    %184 = arith.index_cast %183 : i32 to index
    %c0_71 = arith.constant 0 : index
    %185 = vector.load %arg2[%184, %c0_71] : memref<56x128xf32, #tpu.memory_space<vmem>>, vector<1x128xf32>
    %186 = arith.addf %179, %185 : vector<1x128xf32>
    %c2_i32_72 = arith.constant 2 : i32
    %c24_i32_73 = arith.constant 24 : i32
    %187 = arith.addi %0, %c24_i32_73 : i32
    %188 = arith.addi %187, %c2_i32_72 : i32
    %189 = arith.index_cast %188 : i32 to index
    %190 = memref.load %arg1[%189] : memref<64xi32, #tpu.memory_space<smem>>
    %191 = arith.index_cast %190 : i32 to index
    %c0_74 = arith.constant 0 : index
    %192 = vector.load %arg2[%191, %c0_74] : memref<56x128xf32, #tpu.memory_space<vmem>>, vector<1x128xf32>
    %193 = arith.addf %186, %192 : vector<1x128xf32>
    %c3_i32_75 = arith.constant 3 : i32
    %c24_i32_76 = arith.constant 24 : i32
    %194 = arith.addi %0, %c24_i32_76 : i32
    %195 = arith.addi %194, %c3_i32_75 : i32
    %196 = arith.index_cast %195 : i32 to index
    %197 = memref.load %arg1[%196] : memref<64xi32, #tpu.memory_space<smem>>
    %198 = arith.index_cast %197 : i32 to index
    %c0_77 = arith.constant 0 : index
    %199 = vector.load %arg2[%198, %c0_77] : memref<56x128xf32, #tpu.memory_space<vmem>>, vector<1x128xf32>
    %200 = arith.addf %193, %199 : vector<1x128xf32>
    %c4_i32_78 = arith.constant 4 : i32
    %c24_i32_79 = arith.constant 24 : i32
    %201 = arith.addi %0, %c24_i32_79 : i32
    %202 = arith.addi %201, %c4_i32_78 : i32
    %203 = arith.index_cast %202 : i32 to index
    %204 = memref.load %arg1[%203] : memref<64xi32, #tpu.memory_space<smem>>
    %205 = arith.index_cast %204 : i32 to index
    %c0_80 = arith.constant 0 : index
    %206 = vector.load %arg2[%205, %c0_80] : memref<56x128xf32, #tpu.memory_space<vmem>>, vector<1x128xf32>
    %207 = arith.addf %200, %206 : vector<1x128xf32>
    %c5_i32_81 = arith.constant 5 : i32
    %c24_i32_82 = arith.constant 24 : i32
    %208 = arith.addi %0, %c24_i32_82 : i32
    %209 = arith.addi %208, %c5_i32_81 : i32
    %210 = arith.index_cast %209 : i32 to index
    %211 = memref.load %arg1[%210] : memref<64xi32, #tpu.memory_space<smem>>
    %212 = arith.index_cast %211 : i32 to index
    %c0_83 = arith.constant 0 : index
    %213 = vector.load %arg2[%212, %c0_83] : memref<56x128xf32, #tpu.memory_space<vmem>>, vector<1x128xf32>
    %214 = arith.addf %207, %213 : vector<1x128xf32>
    %c6_i32_84 = arith.constant 6 : i32
    %c24_i32_85 = arith.constant 24 : i32
    %215 = arith.addi %0, %c24_i32_85 : i32
    %216 = arith.addi %215, %c6_i32_84 : i32
    %217 = arith.index_cast %216 : i32 to index
    %218 = memref.load %arg1[%217] : memref<64xi32, #tpu.memory_space<smem>>
    %219 = arith.index_cast %218 : i32 to index
    %c0_86 = arith.constant 0 : index
    %220 = vector.load %arg2[%219, %c0_86] : memref<56x128xf32, #tpu.memory_space<vmem>>, vector<1x128xf32>
    %221 = arith.addf %214, %220 : vector<1x128xf32>
    %c7_i32_87 = arith.constant 7 : i32
    %c24_i32_88 = arith.constant 24 : i32
    %222 = arith.addi %0, %c24_i32_88 : i32
    %223 = arith.addi %222, %c7_i32_87 : i32
    %224 = arith.index_cast %223 : i32 to index
    %225 = memref.load %arg1[%224] : memref<64xi32, #tpu.memory_space<smem>>
    %226 = arith.index_cast %225 : i32 to index
    %c0_89 = arith.constant 0 : index
    %227 = vector.load %arg2[%226, %c0_89] : memref<56x128xf32, #tpu.memory_space<vmem>>, vector<1x128xf32>
    %228 = arith.addf %221, %227 : vector<1x128xf32>
    %c8_i32_90 = arith.constant 8 : i32
    %cst_91 = arith.constant 0.000000e+00 : f32
    %229 = vector.broadcast %cst_91 : f32 to vector<1x128xf32>
    %c0_i32_92 = arith.constant 0 : i32
    %c32_i32 = arith.constant 32 : i32
    %230 = arith.addi %0, %c32_i32 : i32
    %231 = arith.addi %230, %c0_i32_92 : i32
    %232 = arith.index_cast %231 : i32 to index
    %233 = memref.load %arg1[%232] : memref<64xi32, #tpu.memory_space<smem>>
    %234 = arith.index_cast %233 : i32 to index
    %c0_93 = arith.constant 0 : index
    %235 = vector.load %arg2[%234, %c0_93] : memref<56x128xf32, #tpu.memory_space<vmem>>, vector<1x128xf32>
    %236 = arith.addf %229, %235 : vector<1x128xf32>
    %c1_i32_94 = arith.constant 1 : i32
    %c32_i32_95 = arith.constant 32 : i32
    %237 = arith.addi %0, %c32_i32_95 : i32
    %238 = arith.addi %237, %c1_i32_94 : i32
    %239 = arith.index_cast %238 : i32 to index
    %240 = memref.load %arg1[%239] : memref<64xi32, #tpu.memory_space<smem>>
    %241 = arith.index_cast %240 : i32 to index
    %c0_96 = arith.constant 0 : index
    %242 = vector.load %arg2[%241, %c0_96] : memref<56x128xf32, #tpu.memory_space<vmem>>, vector<1x128xf32>
    %243 = arith.addf %236, %242 : vector<1x128xf32>
    %c2_i32_97 = arith.constant 2 : i32
    %c32_i32_98 = arith.constant 32 : i32
    %244 = arith.addi %0, %c32_i32_98 : i32
    %245 = arith.addi %244, %c2_i32_97 : i32
    %246 = arith.index_cast %245 : i32 to index
    %247 = memref.load %arg1[%246] : memref<64xi32, #tpu.memory_space<smem>>
    %248 = arith.index_cast %247 : i32 to index
    %c0_99 = arith.constant 0 : index
    %249 = vector.load %arg2[%248, %c0_99] : memref<56x128xf32, #tpu.memory_space<vmem>>, vector<1x128xf32>
    %250 = arith.addf %243, %249 : vector<1x128xf32>
    %c3_i32_100 = arith.constant 3 : i32
    %c32_i32_101 = arith.constant 32 : i32
    %251 = arith.addi %0, %c32_i32_101 : i32
    %252 = arith.addi %251, %c3_i32_100 : i32
    %253 = arith.index_cast %252 : i32 to index
    %254 = memref.load %arg1[%253] : memref<64xi32, #tpu.memory_space<smem>>
    %255 = arith.index_cast %254 : i32 to index
    %c0_102 = arith.constant 0 : index
    %256 = vector.load %arg2[%255, %c0_102] : memref<56x128xf32, #tpu.memory_space<vmem>>, vector<1x128xf32>
    %257 = arith.addf %250, %256 : vector<1x128xf32>
    %c4_i32_103 = arith.constant 4 : i32
    %c32_i32_104 = arith.constant 32 : i32
    %258 = arith.addi %0, %c32_i32_104 : i32
    %259 = arith.addi %258, %c4_i32_103 : i32
    %260 = arith.index_cast %259 : i32 to index
    %261 = memref.load %arg1[%260] : memref<64xi32, #tpu.memory_space<smem>>
    %262 = arith.index_cast %261 : i32 to index
    %c0_105 = arith.constant 0 : index
    %263 = vector.load %arg2[%262, %c0_105] : memref<56x128xf32, #tpu.memory_space<vmem>>, vector<1x128xf32>
    %264 = arith.addf %257, %263 : vector<1x128xf32>
    %c5_i32_106 = arith.constant 5 : i32
    %c32_i32_107 = arith.constant 32 : i32
    %265 = arith.addi %0, %c32_i32_107 : i32
    %266 = arith.addi %265, %c5_i32_106 : i32
    %267 = arith.index_cast %266 : i32 to index
    %268 = memref.load %arg1[%267] : memref<64xi32, #tpu.memory_space<smem>>
    %269 = arith.index_cast %268 : i32 to index
    %c0_108 = arith.constant 0 : index
    %270 = vector.load %arg2[%269, %c0_108] : memref<56x128xf32, #tpu.memory_space<vmem>>, vector<1x128xf32>
    %271 = arith.addf %264, %270 : vector<1x128xf32>
    %c6_i32_109 = arith.constant 6 : i32
    %c32_i32_110 = arith.constant 32 : i32
    %272 = arith.addi %0, %c32_i32_110 : i32
    %273 = arith.addi %272, %c6_i32_109 : i32
    %274 = arith.index_cast %273 : i32 to index
    %275 = memref.load %arg1[%274] : memref<64xi32, #tpu.memory_space<smem>>
    %276 = arith.index_cast %275 : i32 to index
    %c0_111 = arith.constant 0 : index
    %277 = vector.load %arg2[%276, %c0_111] : memref<56x128xf32, #tpu.memory_space<vmem>>, vector<1x128xf32>
    %278 = arith.addf %271, %277 : vector<1x128xf32>
    %c7_i32_112 = arith.constant 7 : i32
    %c32_i32_113 = arith.constant 32 : i32
    %279 = arith.addi %0, %c32_i32_113 : i32
    %280 = arith.addi %279, %c7_i32_112 : i32
    %281 = arith.index_cast %280 : i32 to index
    %282 = memref.load %arg1[%281] : memref<64xi32, #tpu.memory_space<smem>>
    %283 = arith.index_cast %282 : i32 to index
    %c0_114 = arith.constant 0 : index
    %284 = vector.load %arg2[%283, %c0_114] : memref<56x128xf32, #tpu.memory_space<vmem>>, vector<1x128xf32>
    %285 = arith.addf %278, %284 : vector<1x128xf32>
    %c8_i32_115 = arith.constant 8 : i32
    %cst_116 = arith.constant 0.000000e+00 : f32
    %286 = vector.broadcast %cst_116 : f32 to vector<1x128xf32>
    %c0_i32_117 = arith.constant 0 : i32
    %c40_i32 = arith.constant 40 : i32
    %287 = arith.addi %0, %c40_i32 : i32
    %288 = arith.addi %287, %c0_i32_117 : i32
    %289 = arith.index_cast %288 : i32 to index
    %290 = memref.load %arg1[%289] : memref<64xi32, #tpu.memory_space<smem>>
    %291 = arith.index_cast %290 : i32 to index
    %c0_118 = arith.constant 0 : index
    %292 = vector.load %arg2[%291, %c0_118] : memref<56x128xf32, #tpu.memory_space<vmem>>, vector<1x128xf32>
    %293 = arith.addf %286, %292 : vector<1x128xf32>
    %c1_i32_119 = arith.constant 1 : i32
    %c40_i32_120 = arith.constant 40 : i32
    %294 = arith.addi %0, %c40_i32_120 : i32
    %295 = arith.addi %294, %c1_i32_119 : i32
    %296 = arith.index_cast %295 : i32 to index
    %297 = memref.load %arg1[%296] : memref<64xi32, #tpu.memory_space<smem>>
    %298 = arith.index_cast %297 : i32 to index
    %c0_121 = arith.constant 0 : index
    %299 = vector.load %arg2[%298, %c0_121] : memref<56x128xf32, #tpu.memory_space<vmem>>, vector<1x128xf32>
    %300 = arith.addf %293, %299 : vector<1x128xf32>
    %c2_i32_122 = arith.constant 2 : i32
    %c40_i32_123 = arith.constant 40 : i32
    %301 = arith.addi %0, %c40_i32_123 : i32
    %302 = arith.addi %301, %c2_i32_122 : i32
    %303 = arith.index_cast %302 : i32 to index
    %304 = memref.load %arg1[%303] : memref<64xi32, #tpu.memory_space<smem>>
    %305 = arith.index_cast %304 : i32 to index
    %c0_124 = arith.constant 0 : index
    %306 = vector.load %arg2[%305, %c0_124] : memref<56x128xf32, #tpu.memory_space<vmem>>, vector<1x128xf32>
    %307 = arith.addf %300, %306 : vector<1x128xf32>
    %c3_i32_125 = arith.constant 3 : i32
    %c40_i32_126 = arith.constant 40 : i32
    %308 = arith.addi %0, %c40_i32_126 : i32
    %309 = arith.addi %308, %c3_i32_125 : i32
    %310 = arith.index_cast %309 : i32 to index
    %311 = memref.load %arg1[%310] : memref<64xi32, #tpu.memory_space<smem>>
    %312 = arith.index_cast %311 : i32 to index
    %c0_127 = arith.constant 0 : index
    %313 = vector.load %arg2[%312, %c0_127] : memref<56x128xf32, #tpu.memory_space<vmem>>, vector<1x128xf32>
    %314 = arith.addf %307, %313 : vector<1x128xf32>
    %c4_i32_128 = arith.constant 4 : i32
    %c40_i32_129 = arith.constant 40 : i32
    %315 = arith.addi %0, %c40_i32_129 : i32
    %316 = arith.addi %315, %c4_i32_128 : i32
    %317 = arith.index_cast %316 : i32 to index
    %318 = memref.load %arg1[%317] : memref<64xi32, #tpu.memory_space<smem>>
    %319 = arith.index_cast %318 : i32 to index
    %c0_130 = arith.constant 0 : index
    %320 = vector.load %arg2[%319, %c0_130] : memref<56x128xf32, #tpu.memory_space<vmem>>, vector<1x128xf32>
    %321 = arith.addf %314, %320 : vector<1x128xf32>
    %c5_i32_131 = arith.constant 5 : i32
    %c40_i32_132 = arith.constant 40 : i32
    %322 = arith.addi %0, %c40_i32_132 : i32
    %323 = arith.addi %322, %c5_i32_131 : i32
    %324 = arith.index_cast %323 : i32 to index
    %325 = memref.load %arg1[%324] : memref<64xi32, #tpu.memory_space<smem>>
    %326 = arith.index_cast %325 : i32 to index
    %c0_133 = arith.constant 0 : index
    %327 = vector.load %arg2[%326, %c0_133] : memref<56x128xf32, #tpu.memory_space<vmem>>, vector<1x128xf32>
    %328 = arith.addf %321, %327 : vector<1x128xf32>
    %c6_i32_134 = arith.constant 6 : i32
    %c40_i32_135 = arith.constant 40 : i32
    %329 = arith.addi %0, %c40_i32_135 : i32
    %330 = arith.addi %329, %c6_i32_134 : i32
    %331 = arith.index_cast %330 : i32 to index
    %332 = memref.load %arg1[%331] : memref<64xi32, #tpu.memory_space<smem>>
    %333 = arith.index_cast %332 : i32 to index
    %c0_136 = arith.constant 0 : index
    %334 = vector.load %arg2[%333, %c0_136] : memref<56x128xf32, #tpu.memory_space<vmem>>, vector<1x128xf32>
    %335 = arith.addf %328, %334 : vector<1x128xf32>
    %c7_i32_137 = arith.constant 7 : i32
    %c40_i32_138 = arith.constant 40 : i32
    %336 = arith.addi %0, %c40_i32_138 : i32
    %337 = arith.addi %336, %c7_i32_137 : i32
    %338 = arith.index_cast %337 : i32 to index
    %339 = memref.load %arg1[%338] : memref<64xi32, #tpu.memory_space<smem>>
    %340 = arith.index_cast %339 : i32 to index
    %c0_139 = arith.constant 0 : index
    %341 = vector.load %arg2[%340, %c0_139] : memref<56x128xf32, #tpu.memory_space<vmem>>, vector<1x128xf32>
    %342 = arith.addf %335, %341 : vector<1x128xf32>
    %c8_i32_140 = arith.constant 8 : i32
    %cst_141 = arith.constant 0.000000e+00 : f32
    %343 = vector.broadcast %cst_141 : f32 to vector<1x128xf32>
    %c0_i32_142 = arith.constant 0 : i32
    %c48_i32 = arith.constant 48 : i32
    %344 = arith.addi %0, %c48_i32 : i32
    %345 = arith.addi %344, %c0_i32_142 : i32
    %346 = arith.index_cast %345 : i32 to index
    %347 = memref.load %arg1[%346] : memref<64xi32, #tpu.memory_space<smem>>
    %348 = arith.index_cast %347 : i32 to index
    %c0_143 = arith.constant 0 : index
    %349 = vector.load %arg2[%348, %c0_143] : memref<56x128xf32, #tpu.memory_space<vmem>>, vector<1x128xf32>
    %350 = arith.addf %343, %349 : vector<1x128xf32>
    %c1_i32_144 = arith.constant 1 : i32
    %c48_i32_145 = arith.constant 48 : i32
    %351 = arith.addi %0, %c48_i32_145 : i32
    %352 = arith.addi %351, %c1_i32_144 : i32
    %353 = arith.index_cast %352 : i32 to index
    %354 = memref.load %arg1[%353] : memref<64xi32, #tpu.memory_space<smem>>
    %355 = arith.index_cast %354 : i32 to index
    %c0_146 = arith.constant 0 : index
    %356 = vector.load %arg2[%355, %c0_146] : memref<56x128xf32, #tpu.memory_space<vmem>>, vector<1x128xf32>
    %357 = arith.addf %350, %356 : vector<1x128xf32>
    %c2_i32_147 = arith.constant 2 : i32
    %c48_i32_148 = arith.constant 48 : i32
    %358 = arith.addi %0, %c48_i32_148 : i32
    %359 = arith.addi %358, %c2_i32_147 : i32
    %360 = arith.index_cast %359 : i32 to index
    %361 = memref.load %arg1[%360] : memref<64xi32, #tpu.memory_space<smem>>
    %362 = arith.index_cast %361 : i32 to index
    %c0_149 = arith.constant 0 : index
    %363 = vector.load %arg2[%362, %c0_149] : memref<56x128xf32, #tpu.memory_space<vmem>>, vector<1x128xf32>
    %364 = arith.addf %357, %363 : vector<1x128xf32>
    %c3_i32_150 = arith.constant 3 : i32
    %c48_i32_151 = arith.constant 48 : i32
    %365 = arith.addi %0, %c48_i32_151 : i32
    %366 = arith.addi %365, %c3_i32_150 : i32
    %367 = arith.index_cast %366 : i32 to index
    %368 = memref.load %arg1[%367] : memref<64xi32, #tpu.memory_space<smem>>
    %369 = arith.index_cast %368 : i32 to index
    %c0_152 = arith.constant 0 : index
    %370 = vector.load %arg2[%369, %c0_152] : memref<56x128xf32, #tpu.memory_space<vmem>>, vector<1x128xf32>
    %371 = arith.addf %364, %370 : vector<1x128xf32>
    %c4_i32_153 = arith.constant 4 : i32
    %c48_i32_154 = arith.constant 48 : i32
    %372 = arith.addi %0, %c48_i32_154 : i32
    %373 = arith.addi %372, %c4_i32_153 : i32
    %374 = arith.index_cast %373 : i32 to index
    %375 = memref.load %arg1[%374] : memref<64xi32, #tpu.memory_space<smem>>
    %376 = arith.index_cast %375 : i32 to index
    %c0_155 = arith.constant 0 : index
    %377 = vector.load %arg2[%376, %c0_155] : memref<56x128xf32, #tpu.memory_space<vmem>>, vector<1x128xf32>
    %378 = arith.addf %371, %377 : vector<1x128xf32>
    %c5_i32_156 = arith.constant 5 : i32
    %c48_i32_157 = arith.constant 48 : i32
    %379 = arith.addi %0, %c48_i32_157 : i32
    %380 = arith.addi %379, %c5_i32_156 : i32
    %381 = arith.index_cast %380 : i32 to index
    %382 = memref.load %arg1[%381] : memref<64xi32, #tpu.memory_space<smem>>
    %383 = arith.index_cast %382 : i32 to index
    %c0_158 = arith.constant 0 : index
    %384 = vector.load %arg2[%383, %c0_158] : memref<56x128xf32, #tpu.memory_space<vmem>>, vector<1x128xf32>
    %385 = arith.addf %378, %384 : vector<1x128xf32>
    %c6_i32_159 = arith.constant 6 : i32
    %c48_i32_160 = arith.constant 48 : i32
    %386 = arith.addi %0, %c48_i32_160 : i32
    %387 = arith.addi %386, %c6_i32_159 : i32
    %388 = arith.index_cast %387 : i32 to index
    %389 = memref.load %arg1[%388] : memref<64xi32, #tpu.memory_space<smem>>
    %390 = arith.index_cast %389 : i32 to index
    %c0_161 = arith.constant 0 : index
    %391 = vector.load %arg2[%390, %c0_161] : memref<56x128xf32, #tpu.memory_space<vmem>>, vector<1x128xf32>
    %392 = arith.addf %385, %391 : vector<1x128xf32>
    %c7_i32_162 = arith.constant 7 : i32
    %c48_i32_163 = arith.constant 48 : i32
    %393 = arith.addi %0, %c48_i32_163 : i32
    %394 = arith.addi %393, %c7_i32_162 : i32
    %395 = arith.index_cast %394 : i32 to index
    %396 = memref.load %arg1[%395] : memref<64xi32, #tpu.memory_space<smem>>
    %397 = arith.index_cast %396 : i32 to index
    %c0_164 = arith.constant 0 : index
    %398 = vector.load %arg2[%397, %c0_164] : memref<56x128xf32, #tpu.memory_space<vmem>>, vector<1x128xf32>
    %399 = arith.addf %392, %398 : vector<1x128xf32>
    %c8_i32_165 = arith.constant 8 : i32
    %cst_166 = arith.constant 0.000000e+00 : f32
    %400 = vector.broadcast %cst_166 : f32 to vector<1x128xf32>
    %c0_i32_167 = arith.constant 0 : i32
    %c56_i32 = arith.constant 56 : i32
    %401 = arith.addi %0, %c56_i32 : i32
    %402 = arith.addi %401, %c0_i32_167 : i32
    %403 = arith.index_cast %402 : i32 to index
    %404 = memref.load %arg1[%403] : memref<64xi32, #tpu.memory_space<smem>>
    %405 = arith.index_cast %404 : i32 to index
    %c0_168 = arith.constant 0 : index
    %406 = vector.load %arg2[%405, %c0_168] : memref<56x128xf32, #tpu.memory_space<vmem>>, vector<1x128xf32>
    %407 = arith.addf %400, %406 : vector<1x128xf32>
    %c1_i32_169 = arith.constant 1 : i32
    %c56_i32_170 = arith.constant 56 : i32
    %408 = arith.addi %0, %c56_i32_170 : i32
    %409 = arith.addi %408, %c1_i32_169 : i32
    %410 = arith.index_cast %409 : i32 to index
    %411 = memref.load %arg1[%410] : memref<64xi32, #tpu.memory_space<smem>>
    %412 = arith.index_cast %411 : i32 to index
    %c0_171 = arith.constant 0 : index
    %413 = vector.load %arg2[%412, %c0_171] : memref<56x128xf32, #tpu.memory_space<vmem>>, vector<1x128xf32>
    %414 = arith.addf %407, %413 : vector<1x128xf32>
    %c2_i32_172 = arith.constant 2 : i32
    %c56_i32_173 = arith.constant 56 : i32
    %415 = arith.addi %0, %c56_i32_173 : i32
    %416 = arith.addi %415, %c2_i32_172 : i32
    %417 = arith.index_cast %416 : i32 to index
    %418 = memref.load %arg1[%417] : memref<64xi32, #tpu.memory_space<smem>>
    %419 = arith.index_cast %418 : i32 to index
    %c0_174 = arith.constant 0 : index
    %420 = vector.load %arg2[%419, %c0_174] : memref<56x128xf32, #tpu.memory_space<vmem>>, vector<1x128xf32>
    %421 = arith.addf %414, %420 : vector<1x128xf32>
    %c3_i32_175 = arith.constant 3 : i32
    %c56_i32_176 = arith.constant 56 : i32
    %422 = arith.addi %0, %c56_i32_176 : i32
    %423 = arith.addi %422, %c3_i32_175 : i32
    %424 = arith.index_cast %423 : i32 to index
    %425 = memref.load %arg1[%424] : memref<64xi32, #tpu.memory_space<smem>>
    %426 = arith.index_cast %425 : i32 to index
    %c0_177 = arith.constant 0 : index
    %427 = vector.load %arg2[%426, %c0_177] : memref<56x128xf32, #tpu.memory_space<vmem>>, vector<1x128xf32>
    %428 = arith.addf %421, %427 : vector<1x128xf32>
    %c4_i32_178 = arith.constant 4 : i32
    %c56_i32_179 = arith.constant 56 : i32
    %429 = arith.addi %0, %c56_i32_179 : i32
    %430 = arith.addi %429, %c4_i32_178 : i32
    %431 = arith.index_cast %430 : i32 to index
    %432 = memref.load %arg1[%431] : memref<64xi32, #tpu.memory_space<smem>>
    %433 = arith.index_cast %432 : i32 to index
    %c0_180 = arith.constant 0 : index
    %434 = vector.load %arg2[%433, %c0_180] : memref<56x128xf32, #tpu.memory_space<vmem>>, vector<1x128xf32>
    %435 = arith.addf %428, %434 : vector<1x128xf32>
    %c5_i32_181 = arith.constant 5 : i32
    %c56_i32_182 = arith.constant 56 : i32
    %436 = arith.addi %0, %c56_i32_182 : i32
    %437 = arith.addi %436, %c5_i32_181 : i32
    %438 = arith.index_cast %437 : i32 to index
    %439 = memref.load %arg1[%438] : memref<64xi32, #tpu.memory_space<smem>>
    %440 = arith.index_cast %439 : i32 to index
    %c0_183 = arith.constant 0 : index
    %441 = vector.load %arg2[%440, %c0_183] : memref<56x128xf32, #tpu.memory_space<vmem>>, vector<1x128xf32>
    %442 = arith.addf %435, %441 : vector<1x128xf32>
    %c6_i32_184 = arith.constant 6 : i32
    %c56_i32_185 = arith.constant 56 : i32
    %443 = arith.addi %0, %c56_i32_185 : i32
    %444 = arith.addi %443, %c6_i32_184 : i32
    %445 = arith.index_cast %444 : i32 to index
    %446 = memref.load %arg1[%445] : memref<64xi32, #tpu.memory_space<smem>>
    %447 = arith.index_cast %446 : i32 to index
    %c0_186 = arith.constant 0 : index
    %448 = vector.load %arg2[%447, %c0_186] : memref<56x128xf32, #tpu.memory_space<vmem>>, vector<1x128xf32>
    %449 = arith.addf %442, %448 : vector<1x128xf32>
    %c7_i32_187 = arith.constant 7 : i32
    %c56_i32_188 = arith.constant 56 : i32
    %450 = arith.addi %0, %c56_i32_188 : i32
    %451 = arith.addi %450, %c7_i32_187 : i32
    %452 = arith.index_cast %451 : i32 to index
    %453 = memref.load %arg1[%452] : memref<64xi32, #tpu.memory_space<smem>>
    %454 = arith.index_cast %453 : i32 to index
    %c0_189 = arith.constant 0 : index
    %455 = vector.load %arg2[%454, %c0_189] : memref<56x128xf32, #tpu.memory_space<vmem>>, vector<1x128xf32>
    %456 = arith.addf %449, %455 : vector<1x128xf32>
    %c8_i32_190 = arith.constant 8 : i32
    %457 = tpu.concatenate %57, %114, %171, %228, %285, %342, %399, %456 in 0 : vector<1x128xf32>, vector<1x128xf32>, vector<1x128xf32>, vector<1x128xf32>, vector<1x128xf32>, vector<1x128xf32>, vector<1x128xf32>, vector<1x128xf32> -> vector<8x128xf32>
    %c0_191 = arith.constant 0 : index
    %c0_192 = arith.constant 0 : index
    %458 = vector.load %arg3[%c0_191, %c0_192] : memref<8x128xf32, #tpu.memory_space<vmem>>, vector<8x128xf32>
    tpu.vector_store %arg3[%c0_191, %c0_192], %457 {strides = array<i32>} : memref<8x128xf32, #tpu.memory_space<vmem>>, vector<8x128xf32>,
    return
  }
  func.func @transform_0(%arg0: i32, %arg1: memref<64xi32, #tpu.memory_space<smem>>) -> (i32, i32) {
    %c0_i32 = arith.constant 0 : i32
    %c0_i32_0 = arith.constant 0 : i32
    %c0_i32_1 = arith.constant 0 : i32
    return %c0_i32, %c0_i32_0 : i32, i32
  }
  func.func @transform_1(%arg0: i32, %arg1: memref<64xi32, #tpu.memory_space<smem>>) -> (i32, i32) {
    %c0_i32 = arith.constant 0 : i32
    %c0_i32_0 = arith.constant 0 : i32
    return %arg0, %c0_i32 : i32, i32
  }
}

</mosaic_0001>

<bundles_post_ra>
// kernel: tpu_custom_call.1
= control target key start
LH: loop header
LB: loop body
LE: loop exit
PB: predicated region body
PF: predicated region fallthrough
CT: control target
= control target key end

     0   :  { %s817_s0 = inlined_call_operand.hbm [shape: s32[64], index: 0, kind: input, shape index: {}]   ;;  %s818_s1 = inlined_call_operand.hbm [shape: f32[56,128], index: 1, kind: input, shape index: {}]   ;;  %s819_s2 = inlined_call_operand.hbm [shape: f32[8,128], index: 2, kind: output, shape index: {}]  }
   0x1   :  { %821 = sst [smem:[#allocation16_spill]] %s819_s2  ;;  %s531_s11 = scalar_lea.hbm %s817_s0, 16 }
   0x2   :  { %p532_p0 = scmp.ne.s32.totalorder %s817_s0, %s531_s11  ;;  %p535_p1 = scmp.lt.u32.totalorder %s531_s11, %s817_s0 }
   0x4   :  { %p537_p2 = pnand %p535_p1, %p532_p0 }
   0x6   :  { %540 = shalt.err (!%p537_p2)  }
   0x7   :  { %s591_s16 = smov [#allocation3]  }
   0x8   :  { %8 = dma.hbm_to_smem %s817_s0, 16, %s591_s16, [#allocation2] }
   0x9   :  { %585 = dma.done.wait [#allocation2], 16 }
   0xa   :  { %586 = vsyncadd [#allocation2], 4294967280 }
   0xb   :  { %10 = sfence }
   0xc   :  { %11 = vsyncpa [#allocation5], 0 }
   0xd   :  { %12 = vsyncpa [#allocation6], 0  ;;  %s592_s19 = smov [#allocation4]   ;;  %s541_s23 = scalar_lea.hbm %s818_s1, 896 }
   0xe   :  { %s18_s20 = sshll.u32 %s592_s19, 4  ;;  %p542_p3 = scmp.ne.s32.totalorder %s818_s1, %s541_s23  ;;  %s19_s20 = int_to_ptr.vmem [resolvable:$true] %s18_s20 }
   0xf   :  { %p545_p4 = scmp.lt.u32.totalorder %s541_s23, %s818_s1 }
  0x11   :  { %p547_p5 = pnand %p545_p4, %p542_p3 }
  0x13   :  { %550 = shalt.err (!%p547_p5)
}
  0x14   :  { %s551_s0 = scalar_lea.vmem %s19_s20, 896  ;;  %p556_p7 = scmp.lt.s32.totalorder %s19_s20, %s19_s20 }
  0x15   :  { %p552_p6 = scmp.ne.s32.totalorder %s19_s20, %s551_s0  ;;  %p557_p8 = scmp.lt.s32.totalorder %s551_s0, %s551_s0 }
  0x17   :  { %p558_p9 = por %p557_p8, %p556_p7 }
  0x19   :  { %p559_p10 = pnand %p558_p9, %p552_p6 }
  0x1b   :  { %562 = shalt.err (!%p559_p10)
}
  0x1c   :  { %s593_s28 = smov 128   ;;  %s594_s29 = smov 8  }
  0x1d   :  { %24 = dma.hbm_to_vmem [thread:$0]  %s818_s1, 896, %s19_s20, [#allocation5], %s593_s28, %s593_s28, %s594_s29  }
  0x1e   :  { %587 = dma.done.wait [#allocation5], 896  }
  0x1f   :  { %588 = vsyncadd [#allocation5], 4294966400  ;;  %s635_s4 = sld [smem:[#allocation3]]  ;;  %s637_s5 = sld [smem:[#allocation3 + $0x1]]  ;;  %vm369_vm0 = vcmask 1040384   ;;  %vm371_vm1 = vcmask 1041408  }
  0x20   :  { %s639_s6 = sld [smem:[#allocation3 + $0x2]]  ;;  %s641_s7 = sld [smem:[#allocation3 + $0x3]]  ;;  %vm373_vm2 = vcmask 1042432   ;;  %vm375_vm3 = vcmask 1043456   ;;  %vm377_vm4 = vcmask 1044480   ;;  %vm379_vm5 = vcmask 1045504  }
  0x21   :  { %s643_s8 = sld [smem:[#allocation3 + $0x4]]  ;;  %s645_s9 = sld [smem:[#allocation3 + $0x5]]  ;;  %vm381_vm6 = vcmask 1046528  }
  0x22   :  { %s647_s10 = sld [smem:[#allocation3 + $0x6]]  ;;  %s649_s11 = sld [smem:[#allocation3 + $0x7]] }
  0x23   :  { %s470_s12 = sld [smem:[#allocation3 + $0x8]]  ;;  %s471_s1 = sld [smem:[#allocation3 + $0x9]] }
  0x24   :  { %s651_s13 = sld [smem:[#allocation3 + $0xa]]  ;;  %s653_s14 = sld [smem:[#allocation3 + $0xb]] }
  0x25   :  { %s655_s15 = sld [smem:[#allocation3 + $0xc]]  ;;  %s657_s16 = sld [smem:[#allocation3 + $0xd]] }
  0x26   :  { %s659_s17 = sld [smem:[#allocation3 + $0xe]]  ;;  %s661_s18 = sld [smem:[#allocation3 + $0xf]] }
  0x27   :  { %s478_s19 = sld [smem:[#allocation3 + $0x10]]  ;;  %s479_s20 = sld [smem:[#allocation3 + $0x11]] }
  0x28   :  { %822 = sst [smem:[#allocation11_spill]] %s649_s11  ;;  %s663_s21 = sld [smem:[#allocation3 + $0x12]] }
  0x29   :  { %s665_s22 = sld [smem:[#allocation3 + $0x13]]  ;;  %s667_s23 = sld [smem:[#allocation3 + $0x14]] }
  0x2a   :  { %s669_s24 = sld [smem:[#allocation3 + $0x15]]  ;;  %s671_s25 = sld [smem:[#allocation3 + $0x16]] }
  0x2b   :  { %s673_s26 = sld [smem:[#allocation3 + $0x17]]  ;;  %s70_s27 = scalar_lea.vmem [#allocation4], %s470_s12 }
  0x2c   :  { %823 = sst [smem:[#allocation12_spill]] %s661_s18  ;;  %v71_v0 = vld [vmem:[%s70_s27] sm:$0x1]  ;;  %s675_s0 = sld [smem:[#allocation3 + $0x18]] }
  0x2d   :  { %s677_s28 = sld [smem:[#allocation3 + $0x19]]  ;;  %s75_s29 = scalar_lea.vmem [#allocation4], %s471_s1 }
  0x2e   :  { %v76_v1 = vld [vmem:[%s75_s29] sm:$0x1]  ;;  %s679_s30 = sld [smem:[#allocation3 + $0x1a]]  ;;  %s681_s3 = sld [smem:[#allocation3 + $0x1b]] }
  0x2f   :  { %s110_s2 = scalar_lea.vmem [#allocation4], %s478_s19  ;;  %s683_s11 = sld [smem:[#allocation3 + $0x1c]]  ;;  %v77_v5 = vadd.f32 %v76_v1, %v71_v0 }
  0x30   :  { %v111_v2 = vld [vmem:[%s110_s2] sm:$0x1]  ;;  %s115_s12 = scalar_lea.vmem [#allocation4], %s479_s20  ;;  %s687_s27 = sld [smem:[#allocation3 + $0x1e]] }
  0x31   :  { %824 = sst [smem:[#allocation13_spill]] %s673_s26  ;;  %s685_s26 = sld [smem:[#allocation3 + $0x1d]]  ;;  %v116_v3 = vld [vmem:[%s115_s12] sm:$0x1] }
  0x32   :  { %s689_s1 = sld [smem:[#allocation3 + $0x20]]  ;;  %s691_s29 = sld [smem:[#allocation3 + $0x21]]  ;;  %v117_v8 = vadd.f32 %v116_v3, %v111_v2 }
  0x33   :  { %s30_s18 = scalar_lea.vmem [#allocation4], %s635_s4  ;;  %s694_s2 = sld [smem:[#allocation3 + $0x22]] }
  0x34   :  { %v31_v4 = vld [vmem:[%s30_s18] sm:$0x1]  ;;  %s696_s19 = sld [smem:[#allocation3 + $0x23]]  ;;  %s80_s20 = scalar_lea.vmem [#allocation4], %s651_s13 }
  0x35   :  { %v81_v7 = vld [vmem:[%s80_s20] sm:$0x1]  ;;  %s120_s12 = scalar_lea.vmem [#allocation4], %s663_s21  ;;  %s150_s4 = scalar_lea.vmem [#allocation4], %s675_s0 }
  0x36   :  { %826 = sst [smem:[#allocation15_spill]] %s687_s27  ;;  %v121_v9 = vld [vmem:[%s120_s12] sm:$0x1]  ;;  %s701_s27 = sld [smem:[#allocation3 + $0x1f]]  ;;  %v82_v14 = vadd.f32 %v81_v7, %v77_v5 }
  0x37   :  { %825 = sst [smem:[#allocation14_spill]] %s685_s26  ;;  %s35_s26 = scalar_lea.vmem [#allocation4], %s637_s5  ;;  %v151_v10 = vld [vmem:[%s150_s4] sm:$0x1]  ;;  %v122_v16 = vadd.f32 %v121_v9, %v117_v8 }
  0x38   :  { %v36_v6 = vld [vmem:[%s35_s26] sm:$0x1]  ;;  %s155_s18 = scalar_lea.vmem [#allocation4], %s677_s28  ;;  %s40_s5 = scalar_lea.vmem [#allocation4], %s639_s6 }
  0x39   :  { %v156_v11 = vld [vmem:[%s155_s18] sm:$0x1]  ;;  %v37_v12 = vadd.f32 %v36_v6, %v31_v4  ;;  %s85_s13 = scalar_lea.vmem [#allocation4], %s653_s14  ;;  %s125_s21 = scalar_lea.vmem [#allocation4], %s665_s22 }
  0x3a   :  { %v41_v13 = vld [vmem:[%s40_s5] sm:$0x1]  ;;  %v157_v18 = vadd.f32 %v156_v11, %v151_v10  ;;  %s190_s26 = scalar_lea.vmem [#allocation4], %s689_s1  ;;  %s195_s0 = scalar_lea.vmem [#allocation4], %s691_s29 }
  0x3b   :  { %v86_v15 = vld [vmem:[%s85_s13] sm:$0x1]  ;;  %s45_s28 = scalar_lea.vmem [#allocation4], %s641_s7  ;;  %s160_s20 = scalar_lea.vmem [#allocation4], %s679_s30  ;;  %v42_v23 = vadd.f32 %v41_v13, %v37_v12 }
  0x3c   :  { %v126_v17 = vld [vmem:[%s125_s21] sm:$0x1]  ;;  %s712_s6 = sld [smem:[#allocation3 + $0x24]]  ;;  %v87_v24 = vadd.f32 %v86_v15, %v82_v14  ;;  %s90_s14 = scalar_lea.vmem [#allocation4], %s655_s15 }
  0x3d   :  { %v191_v19 = vld [vmem:[%s190_s26] sm:$0x1]  ;;  %s715_s22 = sld [smem:[#allocation3 + $0x25]]  ;;  %s717_s12 = sld [smem:[#allocation3 + $0x26]]  ;;  %v127_v26 = vadd.f32 %v126_v17, %v122_v16 }
  0x3e   :  { %v196_v20 = vld [vmem:[%s195_s0] sm:$0x1]  ;;  %s130_s1 = scalar_lea.vmem [#allocation4], %s667_s23  ;;  %s720_s7 = sld [smem:[#allocation3 + $0x27]] }
  0x3f   :  { %v46_v21 = vld [vmem:[%s45_s28] sm:$0x1]  ;;  %v197_v28 = vadd.f32 %v196_v20, %v191_v19  ;;  %s722_s30 = sld [smem:[#allocation3 + $0x28]]  ;;  %s200_s29 = scalar_lea.vmem [#allocation4], %s694_s2 }
  0x40   :  { %v161_v22 = vld [vmem:[%s160_s20] sm:$0x1]  ;;  %s725_s4 = sld [smem:[#allocation3 + $0x29]]  ;;  %s727_s15 = sld [smem:[#allocation3 + $0x2a]]  ;;  %v47_v32 = vadd.f32 %v46_v21, %v42_v23 }
  0x41   :  { %v91_v25 = vld [vmem:[%s90_s14] sm:$0x1]  ;;  %v162_v29 = vadd.f32 %v161_v22, %v157_v18  ;;  %s165_s18 = scalar_lea.vmem [#allocation4], %s681_s3  ;;  %s730_s5 = sld [smem:[#allocation3 + $0x2b]] }
  0x42   :  { %v131_v27 = vld [vmem:[%s130_s1] sm:$0x1]  ;;  %s732_s23 = sld [smem:[#allocation3 + $0x2c]]  ;;  %s50_s13 = scalar_lea.vmem [#allocation4], %s643_s8  ;;  %v92_v34 = vadd.f32 %v91_v25, %v87_v24 }
  0x43   :  { %v201_v30 = vld [vmem:[%s200_s29] sm:$0x1]  ;;  %s735_s2 = sld [smem:[#allocation3 + $0x2d]]  ;;  %s737_s21 = sld [smem:[#allocation3 + $0x2e]]  ;;  %v132_v36 = vadd.f32 %v131_v27, %v127_v26 }
  0x44   :  { %v166_v31 = vld [vmem:[%s165_s18] sm:$0x1]  ;;  %s95_s26 = scalar_lea.vmem [#allocation4], %s657_s16  ;;  %v202_v37 = vadd.f32 %v201_v30, %v197_v28  ;;  %s740_s3 = sld [smem:[#allocation3 + $0x2f]] }
  0x45   :  { %v51_v33 = vld [vmem:[%s50_s13] sm:$0x1]  ;;  %s135_s0 = scalar_lea.vmem [#allocation4], %s669_s24  ;;  %v167_v39 = vadd.f32 %v166_v31, %v162_v29  ;;  %s205_s8 = scalar_lea.vmem [#allocation4], %s696_s19 }
  0x46   :  { %v96_v35 = vld [vmem:[%s95_s26] sm:$0x1]  ;;  %s55_s28 = scalar_lea.vmem [#allocation4], %s645_s9  ;;  %s170_s20 = scalar_lea.vmem [#allocation4], %s683_s11  ;;  %v52_v43 = vadd.f32 %v51_v33, %v47_v32 }
  0x47   :  { %v136_v38 = vld [vmem:[%s135_s0] sm:$0x1]  ;;  %v97_v44 = vadd.f32 %v96_v35, %v92_v34  ;;  %s100_s16 = scalar_lea.vmem [#allocation4], %s659_s17  ;;  %s230_s14 = scalar_lea.vmem [#allocation4], %s722_s30 }
  0x48   :  { %v206_v40 = vld [vmem:[%s205_s8] sm:$0x1]  ;;  %s827_s1 = sld [smem:[#allocation12_spill]]  ;;  %v137_v47 = vadd.f32 %v136_v38, %v132_v36  ;;  %s828_s24 = sld [smem:[#allocation14_spill]] }
  0x49   :  { %v56_v41 = vld [vmem:[%s55_s28] sm:$0x1]  ;;  %v207_v48 = vadd.f32 %v206_v40, %v202_v37  ;;  %s235_s19 = scalar_lea.vmem [#allocation4], %s725_s4  ;;  %s240_s9 = scalar_lea.vmem [#allocation4], %s727_s15 }
  0x4a   :  { %v171_v42 = vld [vmem:[%s170_s20] sm:$0x1]  ;;  %s140_s29 = scalar_lea.vmem [#allocation4], %s671_s25  ;;  %s829_s11 = sld [smem:[#allocation13_spill]]  ;;  %v57_v59 = vadd.f32 %v56_v41, %v52_v43 }
  0x4b   :  { %v101_v45 = vld [vmem:[%s100_s16] sm:$0x1]  ;;  %v172_v52 = vadd.f32 %v171_v42, %v167_v39  ;;  %s210_s18 = scalar_lea.vmem [#allocation4], %s712_s6  ;;  %s60_s17 = scalar_lea.vmem [#allocation4], %s647_s10 }
  0x4c   :  { %v231_v46 = vld [vmem:[%s230_s14] sm:$0x1]  ;;  %s245_s26 = scalar_lea.vmem [#allocation4], %s730_s5  ;;  %v102_v60 = vadd.f32 %v101_v45, %v97_v44  ;;  %s830_s25 = sld [smem:[#allocation15_spill]] }
  0x4d   :  { %v236_v49 = vld [vmem:[%s235_s19] sm:$0x1]  ;;  %s757_s15 = sld [smem:[#allocation3 + $0x30]]  ;;  %s759_s6 = sld [smem:[#allocation3 + $0x31]] }
  0x4e   :  { %v241_v50 = vld [vmem:[%s240_s9] sm:$0x1]  ;;  %v237_v54 = vadd.f32 %v236_v49, %v231_v46  ;;  %s105_s30 = scalar_lea.vmem [#allocation4], %s827_s1  ;;  %s175_s13 = scalar_lea.vmem [#allocation4], %s828_s24 }
  0x4f   :  { %v141_v51 = vld [vmem:[%s140_s29] sm:$0x1]  ;;  %s250_s10 = scalar_lea.vmem [#allocation4], %s732_s23  ;;  %s831_s0 = sld [smem:[#allocation11_spill]] }
  0x50   :  { %v211_v53 = vld [vmem:[%s210_s18] sm:$0x1]  ;;  %s145_s4 = scalar_lea.vmem [#allocation4], %s829_s11  ;;  %v242_v62 = vadd.f32 %v241_v50, %v237_v54  ;;  %v142_v63 = vadd.f32 %v141_v51, %v137_v47  ;;  %s762_s8 = sld [smem:[#allocation3 + $0x32]] }
  0x51   :  { %v61_v55 = vld [vmem:[%s60_s17] sm:$0x1]  ;;  %v212_v0 = vadd.f32 %v211_v53, %v207_v48  ;;  %s764_s5 = sld [smem:[#allocation3 + $0x33]]  ;;  %s215_s28 = scalar_lea.vmem [#allocation4], %s715_s22 }
  0x52   :  { %v106_v56 = vld [vmem:[%s105_s30] sm:$0x1]  ;;  %s767_s20 = sld [smem:[#allocation3 + $0x34]]  ;;  %s769_s16 = sld [smem:[#allocation3 + $0x35]]  ;;  %v62_v6 = vadd.f32 %v61_v55, %v57_v59 }
  0x53   :  { %v176_v57 = vld [vmem:[%s175_s13] sm:$0x1]  ;;  %s180_s14 = scalar_lea.vmem [#allocation4], %s830_s25  ;;  %s772_s1 = sld [smem:[#allocation3 + $0x36]]  ;;  %v107_v8 = vadd.f32 %v106_v56, %v102_v60 }
  0x54   :  { %v246_v58 = vld [vmem:[%s245_s26] sm:$0x1]  ;;  %v177_v2 = vadd.f32 %v176_v57, %v172_v52  ;;  %s774_s23 = sld [smem:[#allocation3 + $0x37]]  ;;  %s777_s22 = sld [smem:[#allocation3 + $0x38]] }
  0x55   :  { %v146_v61 = vld [vmem:[%s145_s4] sm:$0x1]  ;;  %v247_v4 = vadd.f32 %v246_v58, %v242_v62  ;;  %s65_s24 = scalar_lea.vmem [#allocation4], %s831_s0  ;;  %s779_s19 = sld [smem:[#allocation3 + $0x39]]  ;;  %v349_v22 = vrot.slane %v107_v8, 7 }
  0x56   :  { %v251_v1 = vld [vmem:[%s250_s10] sm:$0x1]  ;;  %v147_v10 = vadd.f32 %v146_v61, %v142_v63  ;;  %s255_s9 = scalar_lea.vmem [#allocation4], %s735_s2  ;;  %s782_s29 = sld [smem:[#allocation3 + $0x3a]] }
  0x57   :  { %v216_v3 = vld [vmem:[%s215_s28] sm:$0x1]  ;;  %v252_v9 = vadd.f32 %v251_v1, %v247_v4  ;;  %s784_s11 = sld [smem:[#allocation3 + $0x3b]]  ;;  %s185_s18 = scalar_lea.vmem [#allocation4], %s701_s27 }
  0x58   :  { %v181_v5 = vld [vmem:[%s180_s14] sm:$0x1]  ;;  %v217_v11 = vadd.f32 %v216_v3, %v212_v0  ;;  %s220_s17 = scalar_lea.vmem [#allocation4], %s717_s12  ;;  %s270_s30 = scalar_lea.vmem [#allocation4], %s757_s15  ;;  %v352_v26 = vrot.slane %v147_v10, 6 }
  0x59   :  { %v66_v7 = vld [vmem:[%s65_s24] sm:$0x1]  ;;  %v182_v13 = vadd.f32 %v181_v5, %v177_v2  ;;  %s275_s13 = scalar_lea.vmem [#allocation4], %s759_s6  ;;  %s280_s2 = scalar_lea.vmem [#allocation4], %s762_s8 }
  0x5a   :  { %v256_v12 = vld [vmem:[%s255_s9] sm:$0x1]  ;;  %v67_v18 = vadd.f32 %v66_v7, %v62_v6  ;;  %s260_s27 = scalar_lea.vmem [#allocation4], %s737_s21  ;;  %s285_s12 = scalar_lea.vmem [#allocation4], %s764_s5 }
  0x5b   :  { %v186_v14 = vld [vmem:[%s185_s18] sm:$0x1]  ;;  %v257_v19 = vadd.f32 %v256_v12, %v252_v9  ;;  %s225_s26 = scalar_lea.vmem [#allocation4], %s720_s7  ;;  %s290_s4 = scalar_lea.vmem [#allocation4], %s767_s20 }
  0x5c   :  { %v221_v15 = vld [vmem:[%s220_s17] sm:$0x1]  ;;  %v187_v27 = vadd.f32 %v186_v14, %v182_v13  ;;  %s265_s25 = scalar_lea.vmem [#allocation4], %s740_s3  ;;  %s295_s15 = scalar_lea.vmem [#allocation4], %s769_s16  ;;  %v370_v39 = vsel %vm369_vm0, %v67_v18, %v349_v22 }
  0x5d   :  { %v271_v16 = vld [vmem:[%s270_s30] sm:$0x1]  ;;  %v222_v23 = vadd.f32 %v221_v15, %v217_v11  ;;  %s310_s21 = scalar_lea.vmem [#allocation4], %s777_s22  ;;  %s315_s6 = scalar_lea.vmem [#allocation4], %s779_s19  ;;  %v372_v46 = vsel %vm371_vm1, %v370_v39, %v352_v26 }
  0x5e   :  { %v276_v17 = vld [vmem:[%s275_s13] sm:$0x1]  ;;  %s320_s10 = scalar_lea.vmem [#allocation4], %s782_s29  ;;  %s522_s7 = sld [smem:[#allocation3 + $0x3c]]  ;;  %v355_v44 = vrot.slane %v187_v27, 5 }
  0x5f   :  { %v277_v20 = vadd.f32 %v276_v17, %v271_v16  ;;  %v281_v21 = vld [vmem:[%s280_s2] sm:$0x1]  ;;  %s325_s3 = scalar_lea.vmem [#allocation4], %s784_s11  ;;  %s523_s0 = sld [smem:[#allocation3 + $0x3d]] }
  0x60   :  { %v261_v24 = vld [vmem:[%s260_s27] sm:$0x1]  ;;  %s524_s8 = sld [smem:[#allocation3 + $0x3e]]  ;;  %s525_s5 = sld [smem:[#allocation3 + $0x3f]]  ;;  %v374_v53 = vsel %vm373_vm2, %v372_v46, %v355_v44 }
  0x61   :  { %v286_v25 = vld [vmem:[%s285_s12] sm:$0x1]  ;;  %v282_v29 = vadd.f32 %v281_v21, %v277_v20  ;;  %v262_v35 = vadd.f32 %v261_v24, %v257_v19  ;;  %s300_s28 = scalar_lea.vmem [#allocation4], %s772_s1  ;;  %s305_s20 = scalar_lea.vmem [#allocation4], %s774_s23 }
  0x62   :  { %v226_v28 = vld [vmem:[%s225_s26] sm:$0x1]  ;;  %s595_s23 = smov [#allocation7]  }
  0x63   :  { %v291_v30 = vld [vmem:[%s290_s4] sm:$0x1]  ;;  %v287_v36 = vadd.f32 %v286_v25, %v282_v29  ;;  %v227_v40 = vadd.f32 %v226_v28, %v222_v23  ;;  %s390_s22 = sshll.u32 %s595_s23, 4  ;;  %s391_s22 = int_to_ptr.vmem [resolvable:$true] %s390_s22 }
  0x64   :  { %v266_v31 = vld [vmem:[%s265_s25] sm:$0x1]  ;;  %s330_s16 = scalar_lea.vmem [#allocation4], %s522_s7  ;;  %s563_s19 = scalar_lea.vmem %s391_s22, 128 }
  0x65   :  { %v296_v32 = vld [vmem:[%s295_s15] sm:$0x1]  ;;  %v292_v42 = vadd.f32 %v291_v30, %v287_v36  ;;  %v267_v47 = vadd.f32 %v266_v31, %v262_v35  ;;  %v358_v51 = vrot.slane %v227_v40, 4  ;;  %s335_s14 = scalar_lea.vmem [#allocation4], %s523_s0  ;;  %p564_p11 = scmp.ne.s32.totalorder %s391_s22, %s563_s19 }
  0x66   :  { %v311_v33 = vld [vmem:[%s310_s21] sm:$0x1]  ;;  %s340_s1 = scalar_lea.vmem [#allocation4], %s524_s8  ;;  %s345_s24 = scalar_lea.vmem [#allocation4], %s525_s5 }
  0x67   :  { %v316_v34 = vld [vmem:[%s315_s6] sm:$0x1]  ;;  %v297_v48 = vadd.f32 %v296_v32, %v292_v42  ;;  %v361_v58 = vrot.slane %v267_v47, 3  ;;  %v376_v60 = vsel %vm375_vm3, %v374_v53, %v358_v51  ;;  %p568_p12 = scmp.lt.s32.totalorder %s391_s22, %s391_s22  ;;  %p569_p13 = scmp.lt.s32.totalorder %s563_s19, %s563_s19 }
  0x68   :  { %v317_v37 = vadd.f32 %v316_v34, %v311_v33  ;;  %v321_v38 = vld [vmem:[%s320_s10] sm:$0x1] }
  0x69   :  { %v326_v41 = vld [vmem:[%s325_s3] sm:$0x1]  ;;  %v378_v1 = vsel %vm377_vm4, %v376_v60, %v361_v58  ;;  %p570_p0 = por %p569_p13, %p568_p12 }
  0x6a   :  { %v322_v43 = vadd.f32 %v321_v38, %v317_v37  ;;  %v301_v45 = vld [vmem:[%s300_s28] sm:$0x1] }
  0x6b   :  { %v306_v50 = vld [vmem:[%s305_s20] sm:$0x1]  ;;  %v302_v52 = vadd.f32 %v301_v45, %v297_v48  ;;  %p571_p1 = pnand %p570_p0, %p564_p11 }
  0x6c   :  { %v327_v49 = vadd.f32 %v326_v41, %v322_v43  ;;  %v331_v54 = vld [vmem:[%s330_s16] sm:$0x1] }
  0x6d   :  { %v307_v55 = vadd.f32 %v306_v50, %v302_v52  ;;  %v336_v57 = vld [vmem:[%s335_s14] sm:$0x1] }
  0x6e   :  { %v332_v56 = vadd.f32 %v331_v54, %v327_v49  ;;  %v341_v59 = vld [vmem:[%s340_s1] sm:$0x1] }
  0x6f   :  { %v346_v62 = vld [vmem:[%s345_s24] sm:$0x1]  ;;  %v364_v63 = vrot.slane %v307_v55, 2 }
  0x70   :  { %v337_v61 = vadd.f32 %v336_v57, %v332_v56 }
  0x71   :  { %v380_v3 = vsel %vm379_vm5, %v378_v1, %v364_v63 }
  0x72   :  { %v342_v0 = vadd.f32 %v341_v59, %v337_v61 }
  0x74   :  { %v347_v2 = vadd.f32 %v346_v62, %v342_v0 }
  0x76   :  { %v367_v4 = vrot.slane %v347_v2, 1 }
  0x78   :  { %v382_v5 = vsel %vm381_vm6, %v380_v3, %v367_v4 }
  0x79   :  { %383 = vst [vmem:[#allocation7] sm:$0xff] %v382_v5 }
  0x7a   :  { %574 = shalt.err (!%p571_p1)
}
  0x7b   :  { %s832_s11 = sld [smem:[#allocation16_spill]] }
  0x81   :  { %s575_s18 = scalar_lea.hbm %s832_s11, 128 }
  0x82   :  { %p576_p2 = scmp.ne.s32.totalorder %s832_s11, %s575_s18  ;;  %p579_p3 = scmp.lt.u32.totalorder %s575_s18, %s832_s11 }
  0x84   :  { %p581_p4 = pnand %p579_p3, %p576_p2 }
  0x86   :  { %584 = shalt.err (!%p581_p4)
}
  0x87   :  { %393 = dma.vmem_to_hbm [thread:$0]  %s391_s22, 128, %s832_s11, [#allocation6]  }
  0x88   :  { %589 = dma.done.wait [#allocation6], 128  }
  0x89   :  { %590 = vsyncadd [#allocation6], 4294967168 }
  0x8a   :  { %397 = vsyncpa [#allocation5], 1 }
  0x8b   :  { %398 = vsyncpa [#allocation6], 1 }

</bundles_post_ra>
